<compile_context>
chip_gen: v6e
topology: v6e:2x2x1
jax: 0.10.0
libtpu: 0.0.40
codegen_flags: <defaults>
</compile_context>

<pallas_src>
import jax
import jax.numpy as jnp
from jax.experimental import pallas as pl
from jax.experimental.pallas import tpu as pltpu

_LANE = 128
_SUBLANE = 8
# Preferred f32 bytes per logical block (before double buffering).  4 MiB keeps
# the total footprint (2x2 double-buffered in/out + f32 temporaries + slack)
# around ~30 MiB: well under v7x's 64 MiB physical VMEM and large enough to sit
# near the HBM roofline on v5e/v6e (128 MiB VMEM).
_TARGET_BLOCK_BYTES = 4 * 1024 * 1024
# Hard cap for the *minimal* block (very large channel counts).
_MAX_BLOCK_BYTES = 6 * 1024 * 1024


def _round_up(a, m):
    return (a + m - 1) // m * m


def _softmax_c_kernel(x_ref, o_ref):
    """Numerically stable softmax over axis=1 (channel axis) of the block."""
    x = x_ref[...].astype(jnp.float32)
    m = jnp.max(x, axis=1, keepdims=True)
    e = jnp.exp(x - m)
    s = jnp.sum(e, axis=1, keepdims=True)
    if o_ref.dtype == jnp.float32:
        # Write exp() straight into the output block and normalize in place:
        # drops one block-sized f32 temporary (VMEM headroom, esp. on v7x).
        o_ref[...] = e
        o_ref[...] = o_ref[...] / s
    else:
        o_ref[...] = (e / s).astype(o_ref.dtype)


def softmax2d(x, *, target_block_bytes=_TARGET_BLOCK_BYTES):
    """Equivalent of CustomSoftmax2d.forward: softmax along dim=-3.

    Accepts 3D (C, H, W) or 4D (N, C, H, W) inputs, like torch's Softmax2d.
    """
    if x.ndim not in (3, 4):
        raise ValueError(
            f"Softmax2d: expected input to be 3D or 4D, got {x.ndim}D instead"
        )

    squeeze_batch = x.ndim == 3
    if squeeze_batch:
        x = x[None]  # (1, C, H, W)
    N, C, H, W = x.shape
    S = H * W

    itemsize = jnp.dtype(x.dtype).itemsize
    # dtype-aware sublane granularity: 8 rows f32, 16 bf16/f16, 32 int8/fp8.
    sub = max(_SUBLANE, 32 // itemsize)

    use_4d = (S % _LANE == 0) and (C * sub * _LANE * 4 <= _MAX_BLOCK_BYTES)

    if use_4d:
        # --- lane-dense 4D path: (N, C, S) -> (N, C, s_rows, 128) ----------
        # Channel axis stays off the last two dims -> cross-vreg VPU reduce,
        # fully unmasked 128-wide stores.  Reshape is free (contiguous).
        s_rows = S // _LANE
        x_in = x.reshape(N, C, s_rows, _LANE)
        per_row_group = C * _LANE * 4          # f32 bytes per spatial row (x C)
        max_rows = max(sub, (target_block_bytes // per_row_group) // sub * sub)
        if s_rows <= max_rows:
            ts_rows, n_s = s_rows, 1           # full extent (any row count OK)
            per_image = C * s_rows * _LANE * 4
            tn = max(1, min(N, target_block_bytes // max(per_image, 1)))
        else:
            ts_rows = max_rows                 # multiple of `sub`
            n_s = pl.cdiv(s_rows, ts_rows)     # ragged last tile masked by Pallas
            tn = 1
        grid_n = pl.cdiv(N, tn)
        if grid_n * n_s == 1:
            # Guarantee >=2 blocks so both v7x TensorCores get work.
            if N >= 2:
                tn = (N + 1) // 2
                grid_n = pl.cdiv(N, tn)
            elif s_rows >= 2 * sub:
                ts_rows = _round_up(pl.cdiv(s_rows, 2), sub)
                n_s = pl.cdiv(s_rows, ts_rows)
        block = (tn, C, ts_rows, _LANE)
        index_map = lambda n, s: (n, 0, s, 0)
        out_struct = jax.ShapeDtypeStruct((N, C, s_rows, _LANE), x.dtype)
        block_f32 = tn * C * ts_rows * _LANE * 4
    else:
        # --- 3D path: keep (N, C, S); NO host-side pad / output slice ------
        # Reduction over C becomes a sublane/XLU reduce, hidden under DMA.
        x_in = x.reshape(N, C, S)
        per_image = C * S * 4
        if per_image <= target_block_bytes:
            tile_s, n_s = S, 1                 # full extent along S
            tn = max(1, min(N, target_block_bytes // max(per_image, 1)))
        else:
            max_cols = (target_block_bytes // (C * 4)) // _LANE * _LANE
            if max_cols < _LANE:
                if C * _LANE * 4 > _MAX_BLOCK_BYTES:
                    # TODO(synk): add a C-tiled two-pass (online-softmax) kernel
                    # for channel counts whose minimal block exceeds the VMEM
                    # budget (matters on v7x's 64 MiB VMEM).
                    raise NotImplementedError(
                        f"softmax2d: channel count C={C} too large for a "
                        "single-pass VMEM-resident block"
                    )
                max_cols = _LANE
            tile_s = max_cols                  # multiple of 128
            n_s = pl.cdiv(S, tile_s)           # ragged last tile masked by Pallas
            tn = 1
        grid_n = pl.cdiv(N, tn)
        if grid_n * n_s == 1:
            if N >= 2:
                tn = (N + 1) // 2
                grid_n = pl.cdiv(N, tn)
            elif S >= 2 * _LANE:
                tile_s = _round_up(pl.cdiv(S, 2), _LANE)
                n_s = pl.cdiv(S, tile_s)
        block = (tn, C, tile_s)
        index_map = lambda n, s: (n, 0, s)
        out_struct = jax.ShapeDtypeStruct((N, C, S), x.dtype)
        block_f32 = tn * C * tile_s * 4

    # --- VMEM budget --------------------------------------------------------
    block_elems = 1
    for d in block:
        block_elems *= d
    vmem_needed = (
        2 * 2 * block_elems * itemsize   # double-buffered input + output blocks
        + 3 * block_f32                  # f32 temporaries inside the kernel
        + (2 << 20)                      # slack / Mosaic internal scratch
    )
    vmem_limit = int(min(max(vmem_needed, 32 << 20), 56 << 20))

    out = pl.pallas_call(
        _softmax_c_kernel,
        out_shape=out_struct,
        grid_spec=pltpu.PrefetchScalarGridSpec(
            num_scalar_prefetch=0,
            grid=(grid_n, n_s),
            in_specs=[pl.BlockSpec(block, index_map)],
            out_specs=pl.BlockSpec(block, index_map),
        ),
        compiler_params=pltpu.CompilerParams(
            dimension_semantics=("parallel", "parallel"),
            vmem_limit_bytes=vmem_limit,
        ),
    )(x_in)

    out = out.reshape(N, C, H, W)
    if squeeze_batch:
        out = out[0]
    return out


if __name__ == "__main__":
    key = jax.random.PRNGKey(0)
    keys = jax.random.split(key, 5)

    # 1) 4D f32, lane-dense 4D path, batch-blocked / 2-block megacore grid.
    x = jax.random.normal(keys[0], (2, 4, 16, 16), dtype=jnp.float32)
    y = jax.block_until_ready(softmax2d(x))
    ref = jax.nn.softmax(x, axis=-3)
    assert y.shape == x.shape
    assert jnp.allclose(y, ref, atol=1e-5, rtol=1e-5)
    assert jnp.allclose(jnp.sum(y, axis=-3), jnp.ones((2, 16, 16)), atol=1e-5)

    # 2) 3D (CHW) f32 input, H*W not a multiple of 128 (no host pad/slice).
    x3 = jax.random.normal(keys[1], (5, 7, 9), dtype=jnp.float32)
    y3 = jax.block_until_ready(softmax2d(x3))
    ref3 = jax.nn.softmax(x3, axis=-3)
    assert y3.shape == x3.shape
    assert jnp.allclose(y3, ref3, atol=1e-5, rtol=1e-5)

    # 3) bf16, H*W not a multiple of 128.
    xb = jax.random.normal(keys[2], (2, 6, 24, 24), dtype=jnp.bfloat16)
    yb = jax.block_until_ready(softmax2d(xb))
    refb = jax.nn.softmax(xb.astype(jnp.float32), axis=-3)
    assert yb.shape == xb.shape
    assert jnp.allclose(yb.astype(jnp.float32), refb, atol=1e-2)

    # 4) 4D path with tiled spatial axis and a ragged last tile.
    x4 = jax.random.normal(keys[3], (1, 8, 72, 64), dtype=jnp.float32)
    y4 = jax.block_until_ready(softmax2d(x4, target_block_bytes=64 * 1024))
    ref4 = jax.nn.softmax(x4, axis=-3)
    assert jnp.allclose(y4, ref4, atol=1e-5, rtol=1e-5)

    # 5) 3D path with tiled + ragged spatial axis.
    x5 = jax.random.normal(keys[4], (1, 4, 50, 10), dtype=jnp.float32)
    y5 = jax.block_until_ready(softmax2d(x5, target_block_bytes=4 * 1024))
    ref5 = jax.nn.softmax(x5, axis=-3)
    assert jnp.allclose(y5, ref5, atol=1e-5, rtol=1e-5)

    print("KERNEL_OK")
</pallas_src>

<mosaic_0001>
module attributes {stable_mosaic.version = 11 : i64} {
  func.func @_softmax_c_kernel(%arg0: i32, %arg1: i32, %arg2: memref<1x4x2x128xf32, #tpu.memory_space<vmem>>, %arg3: memref<1x4x2x128xf32, #tpu.memory_space<vmem>>) attributes {dimension_semantics = [#tpu.dimension_semantics<parallel>, #tpu.dimension_semantics<parallel>], iteration_bounds = array<i64: 2, 1>, scalar_prefetch = 0 : i64, scratch_operands = 0 : i64, tpu.core_type = #tpu.core_type<tc>, window_params = [{transform_indices = @transform_0, window_bounds = array<i64: 1, 4, 2, 128>}, {transform_indices = @transform_1, window_bounds = array<i64: 1, 4, 2, 128>}]} {
    %c0 = arith.constant 0 : index
    %c0_0 = arith.constant 0 : index
    %c0_1 = arith.constant 0 : index
    %c0_2 = arith.constant 0 : index
    %0 = vector.load %arg2[%c0, %c0_0, %c0_1, %c0_2] : memref<1x4x2x128xf32, #tpu.memory_space<vmem>>, vector<1x4x2x128xf32>
    %cst = arith.constant dense<0xFF800000> : vector<1x2x128xf32>
    %1 = vector.multi_reduction <maximumf>, %0, %cst [1] : vector<1x4x2x128xf32> to vector<1x2x128xf32>
    %2 = vector.shape_cast %1 : vector<1x2x128xf32> to vector<1x1x2x128xf32>
    %3 = vector.broadcast %2 : vector<1x1x2x128xf32> to vector<1x4x2x128xf32>
    %4 = arith.subf %0, %3 : vector<1x4x2x128xf32>
    %5 = math.exp %4 : vector<1x4x2x128xf32>
    %cst_3 = arith.constant dense<0.000000e+00> : vector<1x2x128xf32>
    %6 = vector.multi_reduction <add>, %5, %cst_3 [1] : vector<1x4x2x128xf32> to vector<1x2x128xf32>
    %7 = vector.shape_cast %6 : vector<1x2x128xf32> to vector<1x1x2x128xf32>
    %c0_4 = arith.constant 0 : index
    %c0_5 = arith.constant 0 : index
    %c0_6 = arith.constant 0 : index
    %c0_7 = arith.constant 0 : index
    %8 = vector.load %arg3[%c0_4, %c0_5, %c0_6, %c0_7] : memref<1x4x2x128xf32, #tpu.memory_space<vmem>>, vector<1x4x2x128xf32>
    tpu.vector_store %arg3[%c0_4, %c0_5, %c0_6, %c0_7], %5 {strides = array<i32>} : memref<1x4x2x128xf32, #tpu.memory_space<vmem>>, vector<1x4x2x128xf32>,
    %c0_8 = arith.constant 0 : index
    %c0_9 = arith.constant 0 : index
    %c0_10 = arith.constant 0 : index
    %c0_11 = arith.constant 0 : index
    %9 = vector.load %arg3[%c0_8, %c0_9, %c0_10, %c0_11] : memref<1x4x2x128xf32, #tpu.memory_space<vmem>>, vector<1x4x2x128xf32>
    %10 = vector.broadcast %7 : vector<1x1x2x128xf32> to vector<1x4x2x128xf32>
    %11 = arith.divf %9, %10 : vector<1x4x2x128xf32>
    %c0_12 = arith.constant 0 : index
    %c0_13 = arith.constant 0 : index
    %c0_14 = arith.constant 0 : index
    %c0_15 = arith.constant 0 : index
    %12 = vector.load %arg3[%c0_12, %c0_13, %c0_14, %c0_15] : memref<1x4x2x128xf32, #tpu.memory_space<vmem>>, vector<1x4x2x128xf32>
    tpu.vector_store %arg3[%c0_12, %c0_13, %c0_14, %c0_15], %11 {strides = array<i32>} : memref<1x4x2x128xf32, #tpu.memory_space<vmem>>, vector<1x4x2x128xf32>,
    return
  }
  func.func @transform_0(%arg0: i32, %arg1: i32) -> (i32, i32, i32, i32) {
    %c0_i32 = arith.constant 0 : i32
    %c0_i32_0 = arith.constant 0 : i32
    %c0_i32_1 = arith.constant 0 : i32
    return %arg0, %c0_i32, %arg1, %c0_i32_0 : i32, i32, i32, i32
  }
  func.func @transform_1(%arg0: i32, %arg1: i32) -> (i32, i32, i32, i32) {
    %c0_i32 = arith.constant 0 : i32
    %c0_i32_0 = arith.constant 0 : i32
    %c0_i32_1 = arith.constant 0 : i32
    return %arg0, %c0_i32, %arg1, %c0_i32_0 : i32, i32, i32, i32
  }
}

</mosaic_0001>

<bundles_post_ra>
// kernel: tpu_custom_call.1
= control target key start
LH: loop header
LB: loop body
LE: loop exit
PB: predicated region body
PF: predicated region fallthrough
CT: control target
= control target key end

     0   :  { %6 = vsyncpa [#allocation3], 0  ;;  %s677_s0 = inlined_call_operand.hbm [shape: f32[2,4,2,128], index: 0, kind: input, shape index: {}]   ;;  %s678_s1 = inlined_call_operand.hbm [shape: f32[2,4,2,128], index: 1, kind: output, shape index: {}]  }
   0x1   :  { %8 = vsyncpa [#allocation3 + $0x1], 0 }
   0x2   :  { %9 = vsyncpa [#allocation4], 0 }
   0x3   :  { %11 = vsyncpa [#allocation4 + $0x1], 0  ;;  %s519_s6 = smov 0   ;;  %s521_s7 = smov 0  }
   0x4   :  { %s523_s8 = smov 0   ;;  %s525_s9 = smov 0  }
   0x5   :  { %s527_s10 = smov 0   ;;  %s529_s11 = smov 0  }
   0x6 LB: > { %s300_s12 = sadd.s32 4294967295, %s501_s11   ;;  %s301_s13 = sadd.s32 4294967294, %s501_s11   ;;  %s501_s11 = sphi %s529_s11, %s17_s11   ;;  %s497_s10 = sphi %s527_s10, %s689_s10   ;;  %s493_s9 = sphi %s525_s9, %s688_s9   ;;  %s489_s8 = sphi %s523_s8, %s687_s8   ;;  %s485_s7 = sphi %s521_s7, %s686_s7   ;;  %s481_s6 = sphi %s519_s6, %s685_s6  }
   0x7   : > { %s29_s14 = sadd.s32 1, %s497_s10  ;;  %s38_s15 = sadd.s32 1, %s489_s8 }
   0x8   : > { %p31_p0 = scmp.ge.s32.totalorder %s29_s14, 2  ;;  %p45_p1 = scmp.ne.s32.totalorder %s489_s8, %s485_s7 }
   0x9   : > { %p46_p2 = scmp.eq.s32.totalorder %s501_s11, 0  ;;  %p51_p3 = scmp.ne.s32.totalorder %s485_s7, %s481_s6 }
   0xa   : > { %s691_s14 = smov (%p31_p0, %s29_s14), 0  ;;  %p52_p5 = scmp.eq.s32.totalorder %s300_s12, 0 }
   0xb   : > { %p560_p4 = por %p46_p2, %p45_p1  ;;  %s33_s17 = ssub.s32 %s497_s10, %s691_s14 }
   0xc   : > { %p77_p6 = scmp.eq.s32.totalorder %s300_s12, 1  ;;  %p36_p7 = scmp.eq.s32.totalorder %s33_s17, 0 }
   0xd   : > { %p566_p8 = por %p52_p5, %p51_p3  ;;  %p83_p10 = scmp.eq.s32.totalorder %s301_s13, 1 }
   0xe   : > { %p570_p9 = por %p77_p6, %p45_p1  ;;  %p329_p13 = scmp.lt.s32.totalorder %s501_s11, 2 }
   0xf   : > { %s575_s20 = scalar_select %p36_p7, %s489_s8, %s38_s15  }
  0x10   : > { %p577_p11 = por %p83_p10, %p51_p3  ;;  %s103_s22 = sand.u32 1, %s489_s8  }
  0x11   : > { %s304_s23 = sshll.u32 %s103_s22, 3  ;;  %s315_s24 = sshll.u32 %s497_s10, 7 }
  0x12   : > { %s114_s27 = scalar_lea.hbm %s677_s0, %s315_s24  ;;  %s107_s28 = scalar_lea.vmem [#allocation2], %s304_s23 }
  0x13   : > { %s115_s29 = sshll.u32 %s107_s28, 4  ;;  %p590_p0 = pnand %p329_p13, %p560_p4  ;;  %s116_s29 = int_to_ptr.vmem [resolvable:$true] %s115_s29 }
  0x14   : > { %p307_p1 = scmp.ge.s32.totalorder %s501_s11, 1  ;;  %s104_s2 = scalar_lea.sflag [#allocation3], %s103_s22 }
  0x15   : > { %p395_p2 = pneg %p590_p0  ;;  %s406_s3 = scalar_lea.vmem %s116_s29, 128 }
  0x16   : > { %p407_p3 = scmp.ne.s32.totalorder %s116_s29, %s406_s3  ;;  %s503_s4 = smov [#allocation2]  }
  0x17   : > { %s411_s5 = sshll.u32 %s503_s4, 4  ;;  %s412_s5 = int_to_ptr.vmem [resolvable:$false] %s411_s5 }
  0x18   : > { %p409_p5 = pnand %p407_p3, %p395_p2  ;;  %s413_s12 = scalar_lea.vmem %s412_s5, 256 }
  0x19   : > { %p414_p7 = scmp.lt.s32.totalorder %s116_s29, %s412_s5  ;;  %p415_p10 = scmp.lt.s32.totalorder %s413_s12, %s406_s3 }
  0x1a   : > { %p410_p6 = pneg %p409_p5 }
  0x1b   : > { %p416_p12 = por %p415_p10, %p414_p7 }
  0x1d   : > { %p417_p4 = pnand %p416_p12, %p410_p6 }
  0x1f   : > { %420 = shalt.err (!%p417_p4)
}
  0x20   : > { %s504_s13 = smov 32   ;;  %s505_s15 = smov 2  }
  0x21   : > { %324 = dma.hbm_to_vmem [thread:$0]  (!%p590_p0), %s114_s27, 128, %s116_s29, %s104_s2, %s504_s13, %s504_s13, %s505_s15  }
  0x22   : > { %p123_p13 = scmp.lt.s32.totalorder %s501_s11, 3 }
  0x24   : > { %p124_p2 = pnand %p307_p1, %p123_p13 }
  0x25   : > { %s603_s16 = sand.u32 (!%p124_p2), 1, %s485_s7  }
  0x26   : > { %127 = sbr.rel (%p124_p2) target bundleno = 108 (0x6c), region = 24  ;;  %s308_s17 = sshll.u32 (!%p124_p2), %s603_s16, 3 }
  0x27   : > { %s130_s22 = scalar_lea.sflag (!%p124_p2), [#allocation3], %s603_s16  ;;  %s133_s23 = scalar_lea.vmem (!%p124_p2), [#allocation2], %s308_s17 }
  0x2b   : > { %472 = dma.done.wait (%p566_p8), %s130_s22, 128  }
  0x2c   : > { %474 = vsyncadd (%p566_p8), %s130_s22, 4294967168  ;;  %vm156_vm0 = vcmask 1041408   ;;  %v152_v0 = vld [vmem:[%s133_s23] sm:$0x3]  ;;  %v153_v1 = vld [vmem:[%s133_s23 + $0x2] sm:$0x3] }
  0x2d   : > { %v154_v2 = vld [vmem:[%s133_s23 + $0x4] sm:$0x3]  ;;  %v155_v3 = vld [vmem:[%s133_s23 + $0x6] sm:$0x3]  ;;  %v157_v4 = vsel %vm156_vm0, %v152_v0, -inf  ;;  %v158_v5 = vsel %vm156_vm0, %v153_v1, -inf }
  0x2e   : > { %v159_v6 = vsel %vm156_vm0, %v154_v2, -inf  ;;  %v160_v7 = vsel %vm156_vm0, %v155_v3, -inf  ;;  %v161_v8 = vmax.f32 %v157_v4, %v158_v5  ;;  %s151_s18 = scalar_lea.vmem [#allocation5], %s308_s17  ;;  %s316_s24 = sshll.u32 %s493_s9, 7 }
  0x2f   : > { %v162_v9 = vmax.f32 %v159_v6, %v160_v7  ;;  %s215_s25 = sshll.u32 %s151_s18, 4  ;;  %s627_s28 = scalar_lea.hbm %s678_s1, %s316_s24  ;;  %s629_s25 = int_to_ptr.vmem [resolvable:$true] %s215_s25 }
  0x30   : > { %s201_s9 = scalar_lea.sflag [#allocation4], %s603_s16  ;;  %s421_s29 = scalar_lea.vmem %s629_s25, 128 }
  0x31   : > { %v163_v10 = vmax.f32 %v161_v8, %v162_v9  ;;  %p422_p8 = scmp.ne.s32.totalorder %s629_s25, %s421_s29  ;;  %s506_s30 = smov [#allocation5]  }
  0x32   : > { %s425_s2 = sshll.u32 %s506_s30, 4  ;;  %s426_s2 = int_to_ptr.vmem [resolvable:$false] %s425_s2 }
  0x33   : > { %v164_v11 = vsub.f32 %v152_v0, %v163_v10  ;;  %v165_v12 = vsub.f32 %v153_v1, %v163_v10  ;;  %v166_v13 = vsub.f32 %v154_v2, %v163_v10  ;;  %v167_v14 = vsub.f32 %v155_v3, %v163_v10  ;;  %p423_p12 = pnand %p422_p8, %p570_p9  ;;  %s427_s3 = scalar_lea.vmem %s426_s2, 256 }
  0x34   : > { %p428_p1 = scmp.lt.s32.totalorder %s629_s25, %s426_s2  ;;  %p429_p3 = scmp.lt.s32.totalorder %s427_s3, %s421_s29 }
  0x35   : > { %v168_v15 = vmul.f32 1.442695, %v164_v11  ;;  %v170_v16 = vmul.f32 1.442695, %v165_v12  ;;  %v172_v17 = vmul.f32 1.442695, %v166_v13  ;;  %p424_p0 = pneg %p423_p12 }
  0x36   : > { %v174_v18 = vmul.f32 1.442695, %v167_v14  ;;  %p430_p5 = por %p429_p3, %p428_p1 }
  0x37   : > { %383 = vpow2.f32 %v168_v15 }
  0x38   : > { %385 = vpow2.f32 %v170_v16  ;;  %p431_p6 = pnand %p430_p5, %p424_p0 }
  0x39   : > { %387 = vpow2.f32 %v172_v17 }
  0x3a   : > { %389 = vpow2.f32 %v174_v18 }
  0x44   : > { %v384_v19 = vpop.eup %383 }
  0x45   : > { %v386_v20 = vpop.eup %385  ;;  %v176_v21 = vsel %vm156_vm0, %v384_v19, 0.0  ;;  %183 = vst [vmem:[%s151_s18] sm:$0x3] %v384_v19 }
  0x46   : > { %v388_v22 = vpop.eup %387  ;;  %v177_v23 = vsel %vm156_vm0, %v386_v20, 0.0  ;;  %184 = vst [vmem:[%s151_s18 + $0x2] sm:$0x3] %v386_v20 }
  0x47   : > { %v390_v24 = vpop.eup %389  ;;  %v178_v25 = vadd.f32 %v177_v23, %v176_v21  ;;  %v179_v26 = vsel %vm156_vm0, %v388_v22, 0.0  ;;  %185 = vst [vmem:[%s151_s18 + $0x4] sm:$0x3] %v388_v22 }
  0x48   : > { %v181_v27 = vsel %vm156_vm0, %v390_v24, 0.0  ;;  %186 = vst [vmem:[%s151_s18 + $0x6] sm:$0x3] %v390_v24 }
  0x49   : > { %v180_v28 = vadd.f32 %v179_v26, %v178_v25 }
  0x4b   : > { %v182_v29 = vadd.f32 %v181_v27, %v180_v28 }
  0x4c   : > { %v187_v30 = vld [vmem:[%s151_s18] sm:$0x3] }
  0x4d   : > { %391 = vrcp.f32 %v182_v29  ;;  %v188_v31 = vld [vmem:[%s151_s18 + $0x2] sm:$0x3] }
  0x4e   : > { %v189_v32 = vld [vmem:[%s151_s18 + $0x4] sm:$0x3] }
  0x4f   : > { %v190_v33 = vld [vmem:[%s151_s18 + $0x6] sm:$0x3] }
  0x5a   : > { %v392_v34 = vpop.eup %391 }
  0x5b   : > { %v192_v35 = vmul.f32 %v392_v34, %v187_v30  ;;  %v193_v36 = vmul.f32 %v392_v34, %v188_v31  ;;  %v194_v37 = vmul.f32 %v392_v34, %v189_v32  ;;  %v195_v38 = vmul.f32 %v392_v34, %v190_v33 }
  0x5d   : > { %196 = vst [vmem:[%s151_s18] sm:$0x3] %v192_v35  ;;  %197 = vst [vmem:[%s151_s18 + $0x2] sm:$0x3] %v193_v36 }
  0x5e   : > { %198 = vst [vmem:[%s151_s18 + $0x4] sm:$0x3] %v194_v37  ;;  %199 = vst [vmem:[%s151_s18 + $0x6] sm:$0x3] %v195_v38 }
  0x5f   : > { %434 = shalt.err (!%p431_p6)
}
  0x60   : > { %s435_s4 = scalar_lea.hbm %s627_s28, 128  ;;  %s439_s13 = scalar_lea.hbm %s678_s1, 256 }
  0x61   : > { %p436_p7 = scmp.ne.s32.totalorder %s627_s28, %s435_s4  ;;  %p440_p13 = scmp.lt.s32.totalorder %s627_s28, %s678_s1 }
  0x62   : > { %p441_p2 = scmp.lt.s32.totalorder %s439_s13, %s435_s4 }
  0x63   : > { %p437_p10 = pnand %p436_p7, %p570_p9 }
  0x64   : > { %p442_p8 = por %p441_p2, %p440_p13 }
  0x65   : > { %p438_p4 = pneg %p437_p10 }
  0x67   : > { %p443_p12 = pnand %p442_p8, %p438_p4 }
  0x69   : > { %446 = shalt.err (!%p443_p12)
}
  0x6a   : > { %s507_s22 = smov 32   ;;  %s508_s23 = smov 2  }
  0x6b   : > { %319 = dma.vmem_to_hbm [thread:$0]  (%p570_p9), %s629_s25, 128, %s627_s28, %s201_s9, %s507_s22, %s507_s22, %s508_s23  }
  0x6c PF: > { %s230_s18 = sand.u32 1, %s481_s6   ;;  %p684_p0 = scmp.ge.s32.totalorder %s501_s11, 2 }
  0x6d   : > { %s231_s24 = scalar_lea.sflag [#allocation4], %s230_s18 }
  0x6e   : > { %p326_p1 = pnand %p684_p0, %p577_p11 }
  0x70   : > { %p327_p3 = pneg %p326_p1 }
  0x72   : > { %476 = dma.done.wait (%p327_p3), %s231_s24, 128  }
  0x73   : > { %478 = vsyncadd (%p327_p3), %s231_s24, 4294967168  ;;  %s17_s11 = sadd.s32 1, %s501_s11   ;;  %s685_s6 = smov %s485_s7 }
  0x74   : > { %p14_p5 = scmp.ge.s32.totalorder %s17_s11, 4   ;;  %s686_s7 = smov %s489_s8 }
  0x75   : > { %s687_s8 = smov %s575_s20  ;;  %s688_s9 = smov %s497_s10 }
  0x76   : > { %s689_s10 = smov %s691_s14  ;;  %16 = sbr.rel (!%p14_p5) target bundleno = 6 (0x6), region = 69 }
  0x7b   :  { %236 = vsyncpa [#allocation3], 1 }
  0x7c   :  { %238 = vsyncpa [#allocation3 + $0x1], 1 }
  0x7d   :  { %239 = vsyncpa [#allocation4], 1 }
  0x7e   :  { %241 = vsyncpa [#allocation4 + $0x1], 1 }

</bundles_post_ra>
